<compile_context>
chip_gen: v7x
topology: tpu7x:2x2x1
jax: 0.10.0
libtpu: 0.0.40
codegen_flags: <defaults>
</compile_context>

<pallas_src>
import math
import functools

import jax
import jax.numpy as jnp
from jax.experimental import pallas as pl
from jax.experimental.pallas import tpu as pltpu  # noqa: F401  (TPU-specific tuning hooks)


# ----------------------------- fused Pallas kernel ------------------------------

def _fused_attention_kernel(q_ref, k_ref, v_ref,
                            wq_ref, bq_ref, wk_ref, bk_ref, wv_ref, bv_ref,
                            wo_ref, bo_ref, o_ref, *, num_heads, scale):
    B, Nq, E = q_ref.shape
    Nk = k_ref.shape[1]
    internal = wq_ref.shape[1]
    c = internal // num_heads

    # --- projections: y = x @ W + b (weights already stored as (in, out)) ---
    # Fold the 1/sqrt(c_per_head) softmax scale into q's projection output once,
    # instead of scaling every per-head (B, Nq, Nk) score tensor.
    qp = ((jnp.dot(q_ref[...].reshape(B * Nq, E), wq_ref[...],
                   preferred_element_type=jnp.float32) + bq_ref[...])
          * scale).reshape(B, Nq, internal)
    kp = (jnp.dot(k_ref[...].reshape(B * Nk, E), wk_ref[...],
                  preferred_element_type=jnp.float32) + bk_ref[...]).reshape(B, Nk, internal)
    vp = (jnp.dot(v_ref[...].reshape(B * Nk, E), wv_ref[...],
                  preferred_element_type=jnp.float32) + bv_ref[...]).reshape(B, Nk, internal)

    wo = wo_ref[...]                                   # (internal, E), hoisted load

    # --- per-head attention, heads unrolled (num_heads is tiny). Slicing the
    #     last dim by h*c reproduces _separate_heads/_recombine_heads without
    #     any transpose; out_proj is accumulated per head so only the final
    #     (B, Nq, E) tensor ever leaves VMEM. ---
    acc = jnp.zeros((B * Nq, E), jnp.float32)
    for h in range(num_heads):
        qh = qp[:, :, h * c:(h + 1) * c]               # (B, Nq, c)
        kh = kp[:, :, h * c:(h + 1) * c]               # (B, Nk, c)
        vh = vp[:, :, h * c:(h + 1) * c]               # (B, Nk, c)

        s = jnp.einsum('bqc,bkc->bqk', qh, kh,
                       preferred_element_type=jnp.float32)          # (B, Nq, Nk)
        s = s - jnp.max(s, axis=-1, keepdims=True)     # numerically stable softmax
        p = jnp.exp(s)
        p = p * pl.reciprocal(jnp.sum(p, axis=-1, keepdims=True), approx=False)

        oh = jnp.einsum('bqk,bkc->bqc', p, vh,
                        preferred_element_type=jnp.float32)          # (B, Nq, c)
        acc = acc + jnp.dot(oh.reshape(B * Nq, c), wo[h * c:(h + 1) * c, :],
                            preferred_element_type=jnp.float32)

    y = acc + bo_ref[...]
    o_ref[...] = y.reshape(B, Nq, E).astype(o_ref.dtype)


def _full_spec(shape):
    # Whole array as one block (gridless call) -> fully VMEM-resident.
    return pl.BlockSpec(shape, lambda: (0,) * len(shape))


def fused_attention(q, k, v, wq, bq, wk, bk, wv, bv, wo, bo, *, num_heads):
    B, Nq, E = q.shape
    internal = wq.shape[1]
    scale = 1.0 / math.sqrt(internal // num_heads)
    kernel = functools.partial(_fused_attention_kernel,
                               num_heads=num_heads, scale=scale)
    operands = (q, k, v, wq, bq, wk, bk, wv, bv, wo, bo)
    return pl.pallas_call(
        kernel,
        out_shape=jax.ShapeDtypeStruct((B, Nq, E), q.dtype),
        in_specs=[_full_spec(x.shape) for x in operands],
        out_specs=_full_spec((B, Nq, E)),
    )(*operands)


# --------------------------- Module-level wrapper ---------------------------

class AttentionSubtype:
    """JAX/Pallas port of Attention_Subtype (single fused forward kernel)."""

    def __init__(self, embedding_dim: int, num_heads: int, downsample_rate: int = 1,
                 *, key=None):
        if key is None:
            key = jax.random.PRNGKey(0)
        self.embedding_dim = embedding_dim
        self.internal_dim = embedding_dim // downsample_rate
        self.num_heads = num_heads
        assert self.internal_dim % num_heads == 0, "num_heads must divide embedding_dim."

        def make_linear(k_, in_dim, out_dim):
            kw, kb = jax.random.split(k_)
            lim = 1.0 / math.sqrt(in_dim)
            # Stored pre-transposed (in_dim, out_dim): kernel computes x @ W, no .T.
            w = jax.random.uniform(kw, (in_dim, out_dim), jnp.float32, -lim, lim)
            b = jax.random.uniform(kb, (1, out_dim), jnp.float32, -lim, lim)
            return w, b

        keys = jax.random.split(key, 9)
        # proj_0 .. proj_5 (value projection selected by index i, like counter[i])
        self.v_projs = [make_linear(keys[j], embedding_dim, self.internal_dim)
                        for j in range(6)]
        self.k_proj = make_linear(keys[6], embedding_dim, self.internal_dim)
        self.q_proj = make_linear(keys[7], embedding_dim, self.internal_dim)
        self.out_proj = make_linear(keys[8], self.internal_dim, embedding_dim)

    def __call__(self, q, k, v, i: int):
        wv, bv = self.v_projs[i]          # host-side selection, same as counter[i] in PyTorch
        wq, bq = self.q_proj
        wk, bk = self.k_proj
        wo, bo = self.out_proj
        return fused_attention(q, k, v, wq, bq, wk, bk, wv, bv, wo, bo,
                               num_heads=self.num_heads)


# ------------------------------ pure-JAX reference --------------------------------

def reference_forward(mod: AttentionSubtype, q, k, v, i: int):
    def lin(x, wb):
        w, b = wb
        return x @ w + b                  # weights stored (in, out)

    def sep(x):
        b_, n, cdim = x.shape
        h = mod.num_heads
        return x.reshape(b_, n, h, cdim // h).transpose(0, 2, 1, 3)

    kp = sep(lin(k, mod.k_proj))
    qp = sep(lin(q, mod.q_proj))
    vp = sep(lin(v, mod.v_projs[i]))
    c_per_head = qp.shape[-1]
    attn = jnp.einsum("bhqc,bhkc->bhqk", qp, kp) / math.sqrt(c_per_head)
    attn = jax.nn.softmax(attn, axis=-1)
    out = jnp.einsum("bhqk,bhkc->bhqc", attn, vp)
    b_, h, n, cdim = out.shape
    out = out.transpose(0, 2, 1, 3).reshape(b_, n, h * cdim)
    return lin(out, mod.out_proj)


# ----------------------------------- main -----------------------------------

if __name__ == "__main__":
    embedding_dim = 32
    num_heads = 4
    downsample_rate = 2   # internal_dim = 16, c_per_head = 4
    B, Nq, Nk = 2, 8, 8

    mod = AttentionSubtype(embedding_dim, num_heads, downsample_rate,
                           key=jax.random.PRNGKey(42))

    key = jax.random.PRNGKey(0)
    kq, kk, kv = jax.random.split(key, 3)
    q = jax.random.normal(kq, (B, Nq, embedding_dim), jnp.float32)
    k = jax.random.normal(kk, (B, Nk, embedding_dim), jnp.float32)
    v = jax.random.normal(kv, (B, Nk, embedding_dim), jnp.float32)
    i = 2  # which of proj_0..proj_5 to use for the value projection

    out = mod(q, k, v, i)
    out = jax.block_until_ready(out)

    ref = reference_forward(mod, q, k, v, i)
    assert out.shape == (B, Nq, embedding_dim)
    assert jnp.allclose(out, ref, atol=1e-4, rtol=1e-4), "mismatch vs pure-JAX reference"

    print("KERNEL_OK")
</pallas_src>

<mosaic_0001>
module attributes {stable_mosaic.version = 11 : i64} {
  func.func @_fused_attention_kernel(%arg0: memref<2x8x32xf32, #tpu.memory_space<vmem>>, %arg1: memref<2x8x32xf32, #tpu.memory_space<vmem>>, %arg2: memref<2x8x32xf32, #tpu.memory_space<vmem>>, %arg3: memref<32x16xf32, #tpu.memory_space<vmem>>, %arg4: memref<1x16xf32, #tpu.memory_space<vmem>>, %arg5: memref<32x16xf32, #tpu.memory_space<vmem>>, %arg6: memref<1x16xf32, #tpu.memory_space<vmem>>, %arg7: memref<32x16xf32, #tpu.memory_space<vmem>>, %arg8: memref<1x16xf32, #tpu.memory_space<vmem>>, %arg9: memref<16x32xf32, #tpu.memory_space<vmem>>, %arg10: memref<1x32xf32, #tpu.memory_space<vmem>>, %arg11: memref<2x8x32xf32, #tpu.memory_space<vmem>>) attributes {dimension_semantics = [], scalar_prefetch = 0 : i64, scratch_operands = 0 : i64, tpu.core_type = #tpu.core_type<tc>} {
    %c0 = arith.constant 0 : index
    %c0_0 = arith.constant 0 : index
    %c0_1 = arith.constant 0 : index
    %0 = vector.load %arg0[%c0, %c0_0, %c0_1] : memref<2x8x32xf32, #tpu.memory_space<vmem>>, vector<2x8x32xf32>
    %1 = vector.shape_cast %0 : vector<2x8x32xf32> to vector<16x32xf32>
    %c0_2 = arith.constant 0 : index
    %c0_3 = arith.constant 0 : index
    %2 = vector.load %arg3[%c0_2, %c0_3] : memref<32x16xf32, #tpu.memory_space<vmem>>, vector<32x16xf32>
    %cst = arith.constant dense<0.000000e+00> : vector<16x16xf32>
    %3 = tpu.matmul %1, %2, %cst {dimension_numbers = #tpu.dot_dimension_numbers<[1], [0], [0], [1], [0, 0, 1, 1], [], []>} : vector<16x32xf32>, vector<32x16xf32>, vector<16x16xf32> -> vector<16x16xf32>
    %c0_4 = arith.constant 0 : index
    %c0_5 = arith.constant 0 : index
    %4 = vector.load %arg4[%c0_4, %c0_5] : memref<1x16xf32, #tpu.memory_space<vmem>>, vector<1x16xf32>
    %5 = vector.broadcast %4 : vector<1x16xf32> to vector<16x16xf32>
    %6 = arith.addf %3, %5 : vector<16x16xf32>
    %cst_6 = arith.constant 5.000000e-01 : f32
    %7 = vector.broadcast %cst_6 : f32 to vector<16x16xf32>
    %8 = arith.mulf %6, %7 : vector<16x16xf32>
    %9 = vector.shape_cast %8 : vector<16x16xf32> to vector<2x8x16xf32>
    %c0_7 = arith.constant 0 : index
    %c0_8 = arith.constant 0 : index
    %c0_9 = arith.constant 0 : index
    %10 = vector.load %arg1[%c0_7, %c0_8, %c0_9] : memref<2x8x32xf32, #tpu.memory_space<vmem>>, vector<2x8x32xf32>
    %11 = vector.shape_cast %10 : vector<2x8x32xf32> to vector<16x32xf32>
    %c0_10 = arith.constant 0 : index
    %c0_11 = arith.constant 0 : index
    %12 = vector.load %arg5[%c0_10, %c0_11] : memref<32x16xf32, #tpu.memory_space<vmem>>, vector<32x16xf32>
    %cst_12 = arith.constant dense<0.000000e+00> : vector<16x16xf32>
    %13 = tpu.matmul %11, %12, %cst_12 {dimension_numbers = #tpu.dot_dimension_numbers<[1], [0], [0], [1], [0, 0, 1, 1], [], []>} : vector<16x32xf32>, vector<32x16xf32>, vector<16x16xf32> -> vector<16x16xf32>
    %c0_13 = arith.constant 0 : index
    %c0_14 = arith.constant 0 : index
    %14 = vector.load %arg6[%c0_13, %c0_14] : memref<1x16xf32, #tpu.memory_space<vmem>>, vector<1x16xf32>
    %15 = vector.broadcast %14 : vector<1x16xf32> to vector<16x16xf32>
    %16 = arith.addf %13, %15 : vector<16x16xf32>
    %17 = vector.shape_cast %16 : vector<16x16xf32> to vector<2x8x16xf32>
    %c0_15 = arith.constant 0 : index
    %c0_16 = arith.constant 0 : index
    %c0_17 = arith.constant 0 : index
    %18 = vector.load %arg2[%c0_15, %c0_16, %c0_17] : memref<2x8x32xf32, #tpu.memory_space<vmem>>, vector<2x8x32xf32>
    %19 = vector.shape_cast %18 : vector<2x8x32xf32> to vector<16x32xf32>
    %c0_18 = arith.constant 0 : index
    %c0_19 = arith.constant 0 : index
    %20 = vector.load %arg7[%c0_18, %c0_19] : memref<32x16xf32, #tpu.memory_space<vmem>>, vector<32x16xf32>
    %cst_20 = arith.constant dense<0.000000e+00> : vector<16x16xf32>
    %21 = tpu.matmul %19, %20, %cst_20 {dimension_numbers = #tpu.dot_dimension_numbers<[1], [0], [0], [1], [0, 0, 1, 1], [], []>} : vector<16x32xf32>, vector<32x16xf32>, vector<16x16xf32> -> vector<16x16xf32>
    %c0_21 = arith.constant 0 : index
    %c0_22 = arith.constant 0 : index
    %22 = vector.load %arg8[%c0_21, %c0_22] : memref<1x16xf32, #tpu.memory_space<vmem>>, vector<1x16xf32>
    %23 = vector.broadcast %22 : vector<1x16xf32> to vector<16x16xf32>
    %24 = arith.addf %21, %23 : vector<16x16xf32>
    %25 = vector.shape_cast %24 : vector<16x16xf32> to vector<2x8x16xf32>
    %c0_23 = arith.constant 0 : index
    %c0_24 = arith.constant 0 : index
    %26 = vector.load %arg9[%c0_23, %c0_24] : memref<16x32xf32, #tpu.memory_space<vmem>>, vector<16x32xf32>
    %cst_25 = arith.constant 0.000000e+00 : f32
    %27 = vector.broadcast %cst_25 : f32 to vector<16x32xf32>
    %28 = vector.extract_strided_slice %9 {offsets = [0, 0, 0], sizes = [2, 8, 4], strides = [1, 1, 1]} : vector<2x8x16xf32> to vector<2x8x4xf32>
    %29 = vector.extract_strided_slice %17 {offsets = [0, 0, 0], sizes = [2, 8, 4], strides = [1, 1, 1]} : vector<2x8x16xf32> to vector<2x8x4xf32>
    %30 = vector.extract_strided_slice %25 {offsets = [0, 0, 0], sizes = [2, 8, 4], strides = [1, 1, 1]} : vector<2x8x16xf32> to vector<2x8x4xf32>
    "tpu.trace_start"() <{level = 10 : i32, message = "bqc,bkc->bqk"}> : () -> ()
    %cst_26 = arith.constant dense<0.000000e+00> : vector<2x8x8xf32>
    %31 = tpu.matmul %28, %29, %cst_26 {dimension_numbers = #tpu.dot_dimension_numbers<[2], [2], [1], [1], [0, 0, 0, 1, 1, 1], [0], [0]>} : vector<2x8x4xf32>, vector<2x8x4xf32>, vector<2x8x8xf32> -> vector<2x8x8xf32>
    "tpu.trace_stop"() : () -> ()
    %cst_27 = arith.constant dense<0xFF800000> : vector<2x8xf32>
    %32 = vector.multi_reduction <maximumf>, %31, %cst_27 [2] : vector<2x8x8xf32> to vector<2x8xf32>
    %33 = vector.shape_cast %32 : vector<2x8xf32> to vector<2x8x1xf32>
    %34 = vector.broadcast %33 : vector<2x8x1xf32> to vector<2x8x8xf32>
    %35 = arith.subf %31, %34 : vector<2x8x8xf32>
    %36 = math.exp %35 : vector<2x8x8xf32>
    %cst_28 = arith.constant dense<0.000000e+00> : vector<2x8xf32>
    %37 = vector.multi_reduction <add>, %36, %cst_28 [2] : vector<2x8x8xf32> to vector<2x8xf32>
    %38 = vector.shape_cast %37 : vector<2x8xf32> to vector<2x8x1xf32>
    %39 = tpu.reciprocal %38 : vector<2x8x1xf32> -> vector<2x8x1xf32>
    %40 = vector.broadcast %39 : vector<2x8x1xf32> to vector<2x8x8xf32>
    %41 = arith.mulf %36, %40 : vector<2x8x8xf32>
    "tpu.trace_start"() <{level = 10 : i32, message = "bqk,bkc->bqc"}> : () -> ()
    %cst_29 = arith.constant dense<0.000000e+00> : vector<2x8x4xf32>
    %42 = tpu.matmul %41, %30, %cst_29 {dimension_numbers = #tpu.dot_dimension_numbers<[2], [1], [1], [2], [0, 0, 0, 1, 1, 2], [0], [0]>} : vector<2x8x8xf32>, vector<2x8x4xf32>, vector<2x8x4xf32> -> vector<2x8x4xf32>
    "tpu.trace_stop"() : () -> ()
    %43 = vector.shape_cast %42 : vector<2x8x4xf32> to vector<16x4xf32>
    %44 = vector.extract_strided_slice %26 {offsets = [0, 0], sizes = [4, 32], strides = [1, 1]} : vector<16x32xf32> to vector<4x32xf32>
    %cst_30 = arith.constant dense<0.000000e+00> : vector<16x32xf32>
    %45 = tpu.matmul %43, %44, %cst_30 {dimension_numbers = #tpu.dot_dimension_numbers<[1], [0], [0], [1], [0, 0, 1, 1], [], []>} : vector<16x4xf32>, vector<4x32xf32>, vector<16x32xf32> -> vector<16x32xf32>
    %46 = arith.addf %27, %45 : vector<16x32xf32>
    %47 = vector.extract_strided_slice %9 {offsets = [0, 0, 4], sizes = [2, 8, 4], strides = [1, 1, 1]} : vector<2x8x16xf32> to vector<2x8x4xf32>
    %48 = vector.extract_strided_slice %17 {offsets = [0, 0, 4], sizes = [2, 8, 4], strides = [1, 1, 1]} : vector<2x8x16xf32> to vector<2x8x4xf32>
    %49 = vector.extract_strided_slice %25 {offsets = [0, 0, 4], sizes = [2, 8, 4], strides = [1, 1, 1]} : vector<2x8x16xf32> to vector<2x8x4xf32>
    "tpu.trace_start"() <{level = 10 : i32, message = "bqc,bkc->bqk"}> : () -> ()
    %cst_31 = arith.constant dense<0.000000e+00> : vector<2x8x8xf32>
    %50 = tpu.matmul %47, %48, %cst_31 {dimension_numbers = #tpu.dot_dimension_numbers<[2], [2], [1], [1], [0, 0, 0, 1, 1, 1], [0], [0]>} : vector<2x8x4xf32>, vector<2x8x4xf32>, vector<2x8x8xf32> -> vector<2x8x8xf32>
    "tpu.trace_stop"() : () -> ()
    %cst_32 = arith.constant dense<0xFF800000> : vector<2x8xf32>
    %51 = vector.multi_reduction <maximumf>, %50, %cst_32 [2] : vector<2x8x8xf32> to vector<2x8xf32>
    %52 = vector.shape_cast %51 : vector<2x8xf32> to vector<2x8x1xf32>
    %53 = vector.broadcast %52 : vector<2x8x1xf32> to vector<2x8x8xf32>
    %54 = arith.subf %50, %53 : vector<2x8x8xf32>
    %55 = math.exp %54 : vector<2x8x8xf32>
    %cst_33 = arith.constant dense<0.000000e+00> : vector<2x8xf32>
    %56 = vector.multi_reduction <add>, %55, %cst_33 [2] : vector<2x8x8xf32> to vector<2x8xf32>
    %57 = vector.shape_cast %56 : vector<2x8xf32> to vector<2x8x1xf32>
    %58 = tpu.reciprocal %57 : vector<2x8x1xf32> -> vector<2x8x1xf32>
    %59 = vector.broadcast %58 : vector<2x8x1xf32> to vector<2x8x8xf32>
    %60 = arith.mulf %55, %59 : vector<2x8x8xf32>
    "tpu.trace_start"() <{level = 10 : i32, message = "bqk,bkc->bqc"}> : () -> ()
    %cst_34 = arith.constant dense<0.000000e+00> : vector<2x8x4xf32>
    %61 = tpu.matmul %60, %49, %cst_34 {dimension_numbers = #tpu.dot_dimension_numbers<[2], [1], [1], [2], [0, 0, 0, 1, 1, 2], [0], [0]>} : vector<2x8x8xf32>, vector<2x8x4xf32>, vector<2x8x4xf32> -> vector<2x8x4xf32>
    "tpu.trace_stop"() : () -> ()
    %62 = vector.shape_cast %61 : vector<2x8x4xf32> to vector<16x4xf32>
    %63 = vector.extract_strided_slice %26 {offsets = [4, 0], sizes = [4, 32], strides = [1, 1]} : vector<16x32xf32> to vector<4x32xf32>
    %cst_35 = arith.constant dense<0.000000e+00> : vector<16x32xf32>
    %64 = tpu.matmul %62, %63, %cst_35 {dimension_numbers = #tpu.dot_dimension_numbers<[1], [0], [0], [1], [0, 0, 1, 1], [], []>} : vector<16x4xf32>, vector<4x32xf32>, vector<16x32xf32> -> vector<16x32xf32>
    %65 = arith.addf %46, %64 : vector<16x32xf32>
    %66 = vector.extract_strided_slice %9 {offsets = [0, 0, 8], sizes = [2, 8, 4], strides = [1, 1, 1]} : vector<2x8x16xf32> to vector<2x8x4xf32>
    %67 = vector.extract_strided_slice %17 {offsets = [0, 0, 8], sizes = [2, 8, 4], strides = [1, 1, 1]} : vector<2x8x16xf32> to vector<2x8x4xf32>
    %68 = vector.extract_strided_slice %25 {offsets = [0, 0, 8], sizes = [2, 8, 4], strides = [1, 1, 1]} : vector<2x8x16xf32> to vector<2x8x4xf32>
    "tpu.trace_start"() <{level = 10 : i32, message = "bqc,bkc->bqk"}> : () -> ()
    %cst_36 = arith.constant dense<0.000000e+00> : vector<2x8x8xf32>
    %69 = tpu.matmul %66, %67, %cst_36 {dimension_numbers = #tpu.dot_dimension_numbers<[2], [2], [1], [1], [0, 0, 0, 1, 1, 1], [0], [0]>} : vector<2x8x4xf32>, vector<2x8x4xf32>, vector<2x8x8xf32> -> vector<2x8x8xf32>
    "tpu.trace_stop"() : () -> ()
    %cst_37 = arith.constant dense<0xFF800000> : vector<2x8xf32>
    %70 = vector.multi_reduction <maximumf>, %69, %cst_37 [2] : vector<2x8x8xf32> to vector<2x8xf32>
    %71 = vector.shape_cast %70 : vector<2x8xf32> to vector<2x8x1xf32>
    %72 = vector.broadcast %71 : vector<2x8x1xf32> to vector<2x8x8xf32>
    %73 = arith.subf %69, %72 : vector<2x8x8xf32>
    %74 = math.exp %73 : vector<2x8x8xf32>
    %cst_38 = arith.constant dense<0.000000e+00> : vector<2x8xf32>
    %75 = vector.multi_reduction <add>, %74, %cst_38 [2] : vector<2x8x8xf32> to vector<2x8xf32>
    %76 = vector.shape_cast %75 : vector<2x8xf32> to vector<2x8x1xf32>
    %77 = tpu.reciprocal %76 : vector<2x8x1xf32> -> vector<2x8x1xf32>
    %78 = vector.broadcast %77 : vector<2x8x1xf32> to vector<2x8x8xf32>
    %79 = arith.mulf %74, %78 : vector<2x8x8xf32>
    "tpu.trace_start"() <{level = 10 : i32, message = "bqk,bkc->bqc"}> : () -> ()
    %cst_39 = arith.constant dense<0.000000e+00> : vector<2x8x4xf32>
    %80 = tpu.matmul %79, %68, %cst_39 {dimension_numbers = #tpu.dot_dimension_numbers<[2], [1], [1], [2], [0, 0, 0, 1, 1, 2], [0], [0]>} : vector<2x8x8xf32>, vector<2x8x4xf32>, vector<2x8x4xf32> -> vector<2x8x4xf32>
    "tpu.trace_stop"() : () -> ()
    %81 = vector.shape_cast %80 : vector<2x8x4xf32> to vector<16x4xf32>
    %82 = vector.extract_strided_slice %26 {offsets = [8, 0], sizes = [4, 32], strides = [1, 1]} : vector<16x32xf32> to vector<4x32xf32>
    %cst_40 = arith.constant dense<0.000000e+00> : vector<16x32xf32>
    %83 = tpu.matmul %81, %82, %cst_40 {dimension_numbers = #tpu.dot_dimension_numbers<[1], [0], [0], [1], [0, 0, 1, 1], [], []>} : vector<16x4xf32>, vector<4x32xf32>, vector<16x32xf32> -> vector<16x32xf32>
    %84 = arith.addf %65, %83 : vector<16x32xf32>
    %85 = vector.extract_strided_slice %9 {offsets = [0, 0, 12], sizes = [2, 8, 4], strides = [1, 1, 1]} : vector<2x8x16xf32> to vector<2x8x4xf32>
    %86 = vector.extract_strided_slice %17 {offsets = [0, 0, 12], sizes = [2, 8, 4], strides = [1, 1, 1]} : vector<2x8x16xf32> to vector<2x8x4xf32>
    %87 = vector.extract_strided_slice %25 {offsets = [0, 0, 12], sizes = [2, 8, 4], strides = [1, 1, 1]} : vector<2x8x16xf32> to vector<2x8x4xf32>
    "tpu.trace_start"() <{level = 10 : i32, message = "bqc,bkc->bqk"}> : () -> ()
    %cst_41 = arith.constant dense<0.000000e+00> : vector<2x8x8xf32>
    %88 = tpu.matmul %85, %86, %cst_41 {dimension_numbers = #tpu.dot_dimension_numbers<[2], [2], [1], [1], [0, 0, 0, 1, 1, 1], [0], [0]>} : vector<2x8x4xf32>, vector<2x8x4xf32>, vector<2x8x8xf32> -> vector<2x8x8xf32>
    "tpu.trace_stop"() : () -> ()
    %cst_42 = arith.constant dense<0xFF800000> : vector<2x8xf32>
    %89 = vector.multi_reduction <maximumf>, %88, %cst_42 [2] : vector<2x8x8xf32> to vector<2x8xf32>
    %90 = vector.shape_cast %89 : vector<2x8xf32> to vector<2x8x1xf32>
    %91 = vector.broadcast %90 : vector<2x8x1xf32> to vector<2x8x8xf32>
    %92 = arith.subf %88, %91 : vector<2x8x8xf32>
    %93 = math.exp %92 : vector<2x8x8xf32>
    %cst_43 = arith.constant dense<0.000000e+00> : vector<2x8xf32>
    %94 = vector.multi_reduction <add>, %93, %cst_43 [2] : vector<2x8x8xf32> to vector<2x8xf32>
    %95 = vector.shape_cast %94 : vector<2x8xf32> to vector<2x8x1xf32>
    %96 = tpu.reciprocal %95 : vector<2x8x1xf32> -> vector<2x8x1xf32>
    %97 = vector.broadcast %96 : vector<2x8x1xf32> to vector<2x8x8xf32>
    %98 = arith.mulf %93, %97 : vector<2x8x8xf32>
    "tpu.trace_start"() <{level = 10 : i32, message = "bqk,bkc->bqc"}> : () -> ()
    %cst_44 = arith.constant dense<0.000000e+00> : vector<2x8x4xf32>
    %99 = tpu.matmul %98, %87, %cst_44 {dimension_numbers = #tpu.dot_dimension_numbers<[2], [1], [1], [2], [0, 0, 0, 1, 1, 2], [0], [0]>} : vector<2x8x8xf32>, vector<2x8x4xf32>, vector<2x8x4xf32> -> vector<2x8x4xf32>
    "tpu.trace_stop"() : () -> ()
    %100 = vector.shape_cast %99 : vector<2x8x4xf32> to vector<16x4xf32>
    %101 = vector.extract_strided_slice %26 {offsets = [12, 0], sizes = [4, 32], strides = [1, 1]} : vector<16x32xf32> to vector<4x32xf32>
    %cst_45 = arith.constant dense<0.000000e+00> : vector<16x32xf32>
    %102 = tpu.matmul %100, %101, %cst_45 {dimension_numbers = #tpu.dot_dimension_numbers<[1], [0], [0], [1], [0, 0, 1, 1], [], []>} : vector<16x4xf32>, vector<4x32xf32>, vector<16x32xf32> -> vector<16x32xf32>
    %103 = arith.addf %84, %102 : vector<16x32xf32>
    %c0_46 = arith.constant 0 : index
    %c0_47 = arith.constant 0 : index
    %104 = vector.load %arg10[%c0_46, %c0_47] : memref<1x32xf32, #tpu.memory_space<vmem>>, vector<1x32xf32>
    %105 = vector.broadcast %104 : vector<1x32xf32> to vector<16x32xf32>
    %106 = arith.addf %103, %105 : vector<16x32xf32>
    %107 = vector.shape_cast %106 : vector<16x32xf32> to vector<2x8x32xf32>
    %c0_48 = arith.constant 0 : index
    %c0_49 = arith.constant 0 : index
    %c0_50 = arith.constant 0 : index
    %108 = vector.load %arg11[%c0_48, %c0_49, %c0_50] : memref<2x8x32xf32, #tpu.memory_space<vmem>>, vector<2x8x32xf32>
    tpu.vector_store %arg11[%c0_48, %c0_49, %c0_50], %107 {strides = array<i32>} : memref<2x8x32xf32, #tpu.memory_space<vmem>>, vector<2x8x32xf32>,
    return
  }
}

</mosaic_0001>

<bundles_post_ra>
// kernel: tpu_custom_call.1
= control target key start
LH: loop header
LB: loop body
LE: loop exit
PB: predicated region body
PF: predicated region fallthrough
CT: control target
= control target key end

     0   :  { %vm52_vm0 = vcmask 261120   ;;  %s2672_s0 = inlined_call_operand.vmem [shape: f32[2,8,32], index: 0, kind: input, shape index: {}]   ;;  %s2673_s1 = inlined_call_operand.vmem [shape: f32[2,8,32], index: 1, kind: input, shape index: {}]   ;;  %s2674_s2 = inlined_call_operand.vmem [shape: f32[2,8,32], index: 2, kind: input, shape index: {}]   ;;  %s2675_s3 = inlined_call_operand.vmem [shape: f32[32,16], index: 3, kind: input, shape index: {}]   ;;  %s2676_s4 = inlined_call_operand.vmem [shape: f32[1,16], index: 4, kind: input, shape index: {}]   ;;  %s2677_s5 = inlined_call_operand.vmem [shape: f32[32,16], index: 5, kind: input, shape index: {}]   ;;  %s2678_s6 = inlined_call_operand.vmem [shape: f32[1,16], index: 6, kind: input, shape index: {}]   ;;  %s2679_s7 = inlined_call_operand.vmem [shape: f32[32,16], index: 7, kind: input, shape index: {}]   ;;  %s2680_s8 = inlined_call_operand.vmem [shape: f32[1,16], index: 8, kind: input, shape index: {}]   ;;  %s2681_s9 = inlined_call_operand.vmem [shape: f32[16,32], index: 9, kind: input, shape index: {}]   ;;  %s2682_s10 = inlined_call_operand.vmem [shape: f32[1,32], index: 10, kind: input, shape index: {}]   ;;  %s2683_s11 = inlined_call_operand.hbm [shape: f32[2,8,32], index: 11, kind: output, shape index: {}]  }
   0x1   :  { %v41_v0 = vld [vmem:[%s2675_s3] sm:$0xff]  ;;  %v42_v1 = vld [vmem:[%s2675_s3 + $0x8] sm:$0xff]  ;;  %v43_v5 = vld [vmem:[%s2675_s3 + $0x10] sm:$0xff] }
   0x2   :  { %v138_v2 = vld [vmem:[%s2677_s5] sm:$0xff]  ;;  %v2249_v3 = vpack.c.bf16 %v42_v1, %v41_v0  ;;  %v139_v4 = vld [vmem:[%s2677_s5 + $0x8] sm:$0xff]  ;;  %v44_v6 = vld [vmem:[%s2675_s3 + $0x18] sm:$0xff] }
   0x3   :  { %v2257_v7 = vpack.c.bf16 %v139_v4, %v138_v2  ;;  %v2253_v8 = vpack.c.bf16 %v44_v6, %v43_v5  ;;  %v140_v9 = vld [vmem:[%s2677_s5 + $0x10] sm:$0xff]  ;;  %v141_v10 = vld [vmem:[%s2677_s5 + $0x18] sm:$0xff]  ;;  %v39_v11 = vld [vmem:[%s2672_s0] sm:$0xff] }
   0x4   :  { %2250 = vmatprep.subr.bf16.mxu0 %v2249_v3  ;;  %v2261_v12 = vpack.c.bf16 %v141_v10, %v140_v9  ;;  %2124 = vmatprep.mubr.msk.f32.mxu0 %vm52_vm0, %v39_v11  ;;  %v136_v13 = vld [vmem:[%s2673_s1] sm:$0xff] }
   0x5   :  { %2258 = vmatprep.subr.bf16.mxu1 %v2257_v7  ;;  %2252 = vmatpush3.bf16.msra.mxu0 %v2249_v3 }
   0x6   :  { %16 = vsyncpa [#allocation3], 0  ;;  %2260 = vmatpush3.bf16.msra.mxu1 %v2257_v7  ;;  %2254 = vmatprep.subr.bf16.mxu0 %v2253_v8  ;;  %v40_v14 = vld [vmem:[%s2672_s0 + $0x8] sm:$0xff]  ;;  %v2343_v16 = vmov 0.0   ;;  %vm2344_vm1 = vmmov 0   ;;  %vm326_vm2 = vcmask 31744  }
   0x7   :  { %2262 = vmatprep.subr.bf16.mxu1 %v2261_v12  ;;  %2135 = vmatprep.mubr.msk.f32.mxu1 %vm52_vm0, %v136_v13  ;;  %v137_v15 = vld [vmem:[%s2673_s1 + $0x8] sm:$0xff]  ;;  %v2008_v17 = vld [vmem:[%s2676_s4] ss:$0 sm:$0xff]  ;;  %v234_v31 = vld [vmem:[%s2679_s7 + $0x10] sm:$0xff]  ;;  %vm479_vm3 = vcmask 64512   ;;  %s2346_s14 = smov 120  }
   0x8   :  { %v2011_v19 = vld [vmem:[%s2678_s6] ss:$0 sm:$0xff]  ;;  %v233_v30 = vld [vmem:[%s2679_s7 + $0x8] sm:$0xff]  ;;  %v235_v33 = vld [vmem:[%s2679_s7 + $0x18] sm:$0xff]  ;;  %vm988_vm4 = vcmask 1043456   ;;  %s2348_s18 = smov [#allocation2]  }
   0x9   :  { %2256 = vmatpush3.bf16.msra.mxu0 %v2253_v8  ;;  %v232_v29 = vld [vmem:[%s2679_s7] sm:$0xff]  ;;  %v2269_v35 = vpack.c.bf16 %v235_v33, %v234_v31  ;;  %v231_v36 = vld [vmem:[%s2674_s2 + $0x8] sm:$0xff]  ;;  %s2345_s7 = smov 124   ;;  %s1997_s19 = sshll.u32 %s2348_s18, 4  ;;  %s1998_s19 = int_to_ptr.vmem [resolvable:$true] %s1997_s19 }
   0xa   :  { %2264 = vmatpush3.bf16.msra.mxu1 %v2261_v12  ;;  %v2265_v32 = vpack.c.bf16 %v233_v30, %v232_v29  ;;  %v230_v34 = vld [vmem:[%s2674_s2] sm:$0xff]  ;;  %s2319_s20 = scalar_lea.vmem %s1998_s19, 256  ;;  %p2324_p1 = scmp.lt.s32.totalorder %s1998_s19, %s1998_s19 }
   0xb   :  { %2149 = vmatprep.subr.mxu1 %v2343_v16  ;;  %v2014_v54 = vld [vmem:[%s2680_s8] ss:$0 sm:$0xff]  ;;  %s2347_s8 = smov 116   ;;  %p2320_p0 = scmp.ne.s32.totalorder %s1998_s19, %s2319_s20 }
   0xc   :  { %2125 = vmatmul.mubr.msk.f32.vlgmr.msra.gmra.mrb[0].mxu0 %vm52_vm0, %v40_v14  ;;  %2266 = vmatprep.subr.bf16.mxu0 %v2265_v32  ;;  %p2325_p2 = scmp.lt.s32.totalorder %s2319_s20, %s2319_s20 }
   0xd   :  { %2136 = vmatmul.mubr.msk.f32.vlgmr.msra.gmra.mrb[0].mxu1 %vm52_vm0, %v137_v15  ;;  %2146 = vmatprep.mubr.msk.f32.mxu0 %vm52_vm0, %v230_v34 }
   0xe   :  { %2151 = vmatprep.mubr.msk.f32.mxu1 %vm2344_vm1, %v2343_v16  ;;  %2268 = vmatpush3.bf16.msra.mxu0 %v2265_v32  ;;  %p2326_p3 = por %p2325_p2, %p2324_p1 }
   0xf   :  { %2270 = vmatprep.subr.bf16.mxu0 %v2269_v35 }
  0x10   :  { %p2327_p4 = pnand %p2326_p3, %p2320_p0 }
  0x12   :  { %2272 = vmatpush3.bf16.msra.mxu0 %v2269_v35 }
  0x13   :  { %2169 = vmatprep.subr.mxu0 %v2343_v16 }
  0x15   :  { %2147 = vmatmul.mubr.msk.f32.vlgmr.msra.gmra.mrb[2].mxu0 %vm52_vm0, %v231_v36 }
  0x16   :  { %2171 = vmatprep.mubr.msk.f32.mxu0 %vm2344_vm1, %v2343_v16 }
  0xdf   :  { %v2126_v18 = vpop.f32.mrb[0].mxu0 }
  0xe0   :  { %v2137_v20 = vpop.f32.mrb[0].mxu1  ;;  %v125_v21 = vpop.f32.mrb[1].mxu0  ;;  %v131_v26 = vadd.f32 %v2126_v18, %v2008_v17 }
  0xe1   :  { %v126_v22 = vadd.f32 %v2008_v17, %v125_v21  ;;  %v221_v23 = vpop.f32.mrb[1].mxu1  ;;  %v2467_v27 = vadd.f32 %v2137_v20, %v2011_v19 }
  0xe2   :  { %v2460_v24 = vadd.f32 %v2011_v19, %v221_v23  ;;  %v2475_v28 = vmul.f32 0.5, %v131_v26 }
  0xe3   :  { %v2462_v25 = vmul.f32 0.5, %v126_v22 }
  0xe4   :  { %2150 = vmatpush3.xpose.msk.msra.mxu1 %vm326_vm2, %v2460_v24 }
  0xe5   :  { %2154 = vmatprep.subr.mxu1 %v2343_v16 }
  0xe7   :  { %2152 = vmatmul.mubr.msk.f32.vlgmr.msra.gmra.mrb[2].mxu1 %vm326_vm2, %v2462_v25 }
  0xe8   :  { %2155 = vmatpush3.xpose.msk.msra.mxu1 %vm326_vm2, %v2467_v27  ;;  %2156 = vmatprep.mubr.msk.f32.mxu1 %vm2344_vm1, %v2343_v16  ;;  %v2148_v53 = vpop.f32.mrb[2].mxu0 }
  0xe9   :  { %2159 = vmatprep.subr.mxu1 %v2343_v16  ;;  %v315_v55 = vpop.f32.mrb[3].mxu0  ;;  %v2516_v56 = vadd.f32 %v2148_v53, %v2014_v54 }
  0xea   :  { %v2518_v57 = vadd.f32 %v2014_v54, %v315_v55 }
  0xeb   :  { %2157 = vmatmul.mubr.msk.f32.vlgmr.msra.gmra.mrb[4].mxu1 %vm326_vm2, %v2475_v28 }
  0xec   :  { %2161 = vmatprep.mubr.msk.f32.mxu1 %vm2344_vm1, %v2343_v16  ;;  %2160 = vmatpush3.msra.mxu1 %v2518_v57 }
  0xed   :  { %2164 = vmatprep.subr.mxu1 %v2343_v16 }
 0x1ba   :  { %v399_v37 = vpop.f32.mrb[2].mxu1 }
 0x1bb   :  { %v2153_v38 = vpop.f32.mrb[3].mxu1  ;;  %v480_v39 = vsel %vm479_vm3, %v399_v37, -inf }
 0x1bc   :  { %481 = vmax.xlane.f32.xlu0 %v480_v39 }
 0x1be   :  { %v475_v40 = vpop.f32.mrb[4].mxu1 }
 0x1bf   :  { %v2158_v41 = vpop.f32.mrb[5].mxu1  ;;  %v483_v42 = vsel %vm479_vm3, %v475_v40, -inf }
 0x1c0   :  { %484 = vmax.xlane.f32.xlu0 %v483_v42 }
 0x1d6   :  { %728 = vrot.lane.b32.xlu0 %v2467_v27, %s2345_s7 }
 0x249   :  { %v482_v43 = vpop.xlane.xlu0 %481 }
 0x24a   :  { %v486_v44 = vsub.f32 %v399_v37, %v482_v43 }
 0x24c   :  { %v488_v45 = vmul.f32 1.442695, %v486_v44 }
 0x24d   :  { %v485_v46 = vpop.xlane.xlu0 %484 }
 0x24e   :  { %2287 = vpow2.f32 %v488_v45  ;;  %v487_v47 = vsub.f32 %v475_v40, %v485_v46 }
 0x250   :  { %v490_v48 = vmul.f32 1.442695, %v487_v47  ;;  %v324_v47 = vld [vmem:[%s2681_s9] sm:$0xff] }
 0x251   :  { %v729_v3 = vpop.permute.xlu0 %728 }
 0x252   :  { %2289 = vpow2.f32 %v490_v48  ;;  %v981_v48 = vrot.slane %v324_v47, 4 }
 0x258   :  { %v2288_v49 = vpop.eup %2287 }
 0x259   :  { %v492_v50 = vsel %vm479_vm3, %v2288_v49, 0.0 }
 0x25a   :  { %493 = vadd.xlane.f32.xlu1 %v492_v50 }
 0x25c   :  { %v2290_v51 = vpop.eup %2289 }
 0x25d   :  { %v495_v52 = vsel %vm479_vm3, %v2290_v51, 0.0 }
 0x25e   :  { %496 = vadd.xlane.f32.xlu1 %v495_v52 }
 0x26f   :  { %726 = vrot.lane.b32.xlu1 %v2475_v28, %s2345_s7 }
 0x273   :  { %650 = vrot.lane.b32.xlu1 %v2460_v24, %s2345_s7 }
 0x277   :  { %648 = vrot.lane.b32.xlu1 %v2462_v25, %s2345_s7 }
 0x27b   :  { %1151 = vrot.lane.b32.xlu1 %v2460_v24, %s2346_s14 }
 0x2e7   :  { %v494_v58 = vpop.xlane.xlu1 %493 }
 0x2e8   :  { %2291 = vrcp.f32 %v494_v58 }
 0x2eb   :  { %v497_v59 = vpop.xlane.xlu1 %496 }
 0x2ec   :  { %2293 = vrcp.f32 %v497_v59 }
 0x2ef   :  { %v727_v60 = vpop.permute.xlu1 %726 }
 0x2f2   :  { %v2292_v61 = vpop.eup %2291 }
 0x2f3   :  { %v500_v62 = vmul.f32 %v2292_v61, %v2288_v49  ;;  %v651_v63 = vpop.permute.xlu1 %650 }
 0x2f4   :  { %2170 = vmatpush3.xpose.msk.msra.mxu0 %vm326_vm2, %v651_v63 }
 0x2f5   :  { %2162 = vmatmul.mubr.msk.f32.vlgmr.msra.gmra.mrb[6].mxu1 %vm479_vm3, %v500_v62  ;;  %2179 = vmatprep.subr.mxu0 %v2343_v16 }
 0x2f6   :  { %v2294_v0 = vpop.eup %2293  ;;  %2165 = vmatpush3.msra.mxu1 %v2516_v56  ;;  %2166 = vmatprep.mubr.msk.f32.mxu1 %vm2344_vm1, %v2343_v16 }
 0x2f7   :  { %v501_v1 = vmul.f32 %v2294_v0, %v2290_v51  ;;  %v649_v2 = vpop.permute.xlu1 %648  ;;  %2174 = vmatprep.subr.mxu1 %v2343_v16  ;;  %v2615_v0 = vld [vmem:[%s2681_s9 + $0x8] sm:$0xff] }
 0x2f8   :  { %2172 = vmatmul.mubr.msk.f32.vlgmr.msra.gmra.mrb[4].mxu0 %vm326_vm2, %v649_v2 }
 0x2f9   :  { %2167 = vmatmul.mubr.msk.f32.vlgmr.msra.gmra.mrb[8].mxu1 %vm479_vm3, %v501_v1  ;;  %2181 = vmatprep.mubr.msk.f32.mxu0 %vm2344_vm1, %v2343_v16 }
 0x2fa   :  { %2176 = vmatprep.mubr.msk.f32.mxu1 %vm2344_vm1, %v2343_v16 }
 0x2fb   :  { %v1152_v21 = vpop.permute.xlu1 %1151 }
 0x2fd   :  { %2175 = vmatpush3.xpose.msk.msra.mxu1 %vm326_vm2, %v729_v3 }
 0x2fe   :  { %2184 = vmatprep.subr.mxu1 %v2343_v16 }
 0x300   :  { %2177 = vmatmul.mubr.msk.f32.vlgmr.msra.gmra.mrb[10].mxu1 %vm326_vm2, %v727_v60 }
 0x301   :  { %2186 = vmatprep.mubr.msk.f32.mxu1 %vm2344_vm1, %v2343_v16 }
 0x3c8   :  { %v2546_v4 = vpop.f32.mrb[6].mxu1 }
 0x3c9   :  { %v2163_v5 = vpop.f32.mrb[7].mxu1 }
 0x3cb   :  { %v722_v6 = vpop.f32.mrb[4].mxu0 }
 0x3cc   :  { %v2548_v7 = vpop.f32.mrb[8].mxu1  ;;  %v2173_v8 = vpop.f32.mrb[5].mxu0  ;;  %v804_v20 = vsel %vm479_vm3, %v722_v6, -inf }
 0x3cd   :  { %v2168_v9 = vpop.f32.mrb[9].mxu1 }
 0x3d3   :  { %v800_v10 = vpop.f32.mrb[10].mxu1 }
 0x3d4   :  { %v2178_v11 = vpop.f32.mrb[11].mxu1  ;;  %v807_v12 = vsel %vm479_vm3, %v800_v10, -inf }
 0x3d5   :  { %808 = vmax.xlane.f32.xlu0 %v807_v12 }
 0x3eb   :  { %904 = vrot.lane.b32.xlu0 %v2516_v56, %s2345_s7 }
 0x3ef   :  { %1149 = vrot.lane.b32.xlu0 %v2462_v25, %s2346_s14 }
 0x3f3   :  { %1227 = vrot.lane.b32.xlu0 %v2475_v28, %s2346_s14 }
 0x462   :  { %v809_v13 = vpop.xlane.xlu0 %808 }
 0x463   :  { %v811_v14 = vsub.f32 %v800_v10, %v809_v13 }
 0x465   :  { %v814_v15 = vmul.f32 1.442695, %v811_v14 }
 0x466   :  { %v905_v17 = vpop.permute.xlu0 %904 }
 0x467   :  { %2295 = vpow2.f32 %v814_v15  ;;  %2185 = vmatpush3.msra.mxu1 %v905_v17 }
 0x468   :  { %2199 = vmatprep.subr.mxu1 %v2343_v16 }
 0x46a   :  { %v1150_v29 = vpop.permute.xlu0 %1149 }
 0x46e   :  { %v1228_v31 = vpop.permute.xlu0 %1227 }
 0x471   :  { %v2296_v18 = vpop.eup %2295 }
 0x472   :  { %v819_v19 = vsel %vm479_vm3, %v2296_v18, 0.0 }
 0x473   :  { %820 = vadd.xlane.f32.xlu1 %v819_v19 }
 0x484   :  { %1229 = vrot.lane.b32.xlu1 %v2467_v27, %s2346_s14 }
 0x4a8   :  { %805 = vmax.xlane.f32.xlu1 %v804_v20 }
 0x500   :  { %v821_v22 = vpop.xlane.xlu1 %820 }
 0x501   :  { %2297 = vrcp.f32 %v821_v22 }
 0x504   :  { %v1230_v30 = vpop.permute.xlu1 %1229 }
 0x50b   :  { %v2298_v23 = vpop.eup %2297 }
 0x50c   :  { %v825_v26 = vmul.f32 %v2298_v23, %v2296_v18 }
 0x50e   :  { %2187 = vmatmul.mubr.msk.f32.vlgmr.msra.gmra.mrb[12].mxu1 %vm479_vm3, %v825_v26 }
 0x50f   :  { %2200 = vmatpush3.xpose.msk.msra.mxu1 %vm326_vm2, %v1152_v21  ;;  %2201 = vmatprep.mubr.msk.f32.mxu1 %vm2344_vm1, %v2343_v16 }
 0x510   :  { %2204 = vmatprep.subr.mxu1 %v2343_v16 }
 0x512   :  { %2202 = vmatmul.mubr.msk.f32.vlgmr.msra.gmra.mrb[14].mxu1 %vm326_vm2, %v1150_v29 }
 0x513   :  { %2205 = vmatpush3.xpose.msk.msra.mxu1 %vm326_vm2, %v1230_v30  ;;  %2206 = vmatprep.mubr.msk.f32.mxu1 %vm2344_vm1, %v2343_v16 }
 0x514   :  { %2214 = vmatprep.subr.mxu1 %v2343_v16 }
 0x516   :  { %2207 = vmatmul.mubr.msk.f32.vlgmr.msra.gmra.mrb[16].mxu1 %vm326_vm2, %v1228_v31 }
 0x517   :  { %2216 = vmatprep.mubr.msk.f32.mxu1 %vm2344_vm1, %v2343_v16 }
 0x535   :  { %v806_v32 = vpop.xlane.xlu1 %805 }
 0x536   :  { %v810_v33 = vsub.f32 %v722_v6, %v806_v32 }
 0x538   :  { %v812_v34 = vmul.f32 1.442695, %v810_v33 }
 0x53a   :  { %2299 = vpow2.f32 %v812_v34 }
 0x544   :  { %v2300_v35 = vpop.eup %2299 }
 0x545   :  { %v816_v36 = vsel %vm479_vm3, %v2300_v35, 0.0 }
 0x546   :  { %817 = vadd.xlane.f32.xlu0 %v816_v36 }
 0x55c   :  { %827 = vrot.lane.b32.xlu0 %v2518_v57, %s2345_s7 }
 0x560   :  { %1403 = vrot.lane.b32.xlu0 %v2516_v56, %s2346_s14 }
 0x564   :  { %1567 = vrot.lane.b32.xlu0 %v2460_v24, %s2347_s8 }
 0x568   :  { %1645 = vrot.lane.b32.xlu0 %v2467_v27, %s2347_s8 }
 0x56c   :  { %1565 = vrot.lane.b32.xlu0 %v2462_v25, %s2347_s8 }
 0x5d3   :  { %v818_v37 = vpop.xlane.xlu0 %817 }
 0x5d4   :  { %2301 = vrcp.f32 %v818_v37 }
 0x5d7   :  { %v828_v38 = vpop.permute.xlu0 %827 }
 0x5d8   :  { %2180 = vmatpush3.msra.mxu0 %v828_v38 }
 0x5d9   :  { %2189 = vmatprep.subr.msk.mxu0 %vm988_vm4, %v981_v48 }
 0x5db   :  { %v1404_v39 = vpop.permute.xlu0 %1403 }
 0x5dc   :  { %2215 = vmatpush3.msra.mxu1 %v1404_v39 }
 0x5dd   :  { %2224 = vmatprep.subr.mxu1 %v2343_v16 }
 0x5de   :  { %v2302_v40 = vpop.eup %2301 }
 0x5df   :  { %v824_v41 = vmul.f32 %v2302_v40, %v2300_v35  ;;  %v1568_v2 = vpop.permute.xlu0 %1567 }
 0x5e1   :  { %2182 = vmatmul.mubr.msk.f32.vlgmr.msra.gmra.mrb[6].mxu0 %vm479_vm3, %v824_v41  ;;  %v976_v42 = vpop.f32.mrb[12].mxu1 }
 0x5e2   :  { %v2188_v24 = vpop.f32.mrb[13].mxu1  ;;  %2190 = vmatpush3.msk.msra.mxu0 %vm988_vm4, %v981_v48 }
 0x5e3   :  { %2194 = vmatprep.subr.msk.mxu0 %vm988_vm4, %v324_v47  ;;  %v1646_v6 = vpop.permute.xlu0 %1645 }
 0x5e5   :  { %v1223_v43 = vpop.f32.mrb[14].mxu1 }
 0x5e6   :  { %v2203_v44 = vpop.f32.mrb[15].mxu1  ;;  %v1305_v27 = vsel %vm479_vm3, %v1223_v43, -inf }
 0x5e7   :  { %1306 = vmax.xlane.f32.xlu1 %v1305_v27  ;;  %v1566_v8 = vpop.permute.xlu0 %1565  ;;  %v2053_v44 = vld [vmem:[%s2682_s10] ss:$0 sm:$0xff] }
 0x5e9   :  { %v1301_v25 = vpop.f32.mrb[16].mxu1 }
 0x5ea   :  { %v2208_v45 = vpop.f32.mrb[17].mxu1  ;;  %v1308_v46 = vsel %vm479_vm3, %v1301_v25, -inf }
 0x5eb   :  { %1309 = vmax.xlane.f32.xlu1 %v1308_v46 }
 0x674   :  { %v1307_v49 = vpop.xlane.xlu1 %1306 }
 0x675   :  { %v1311_v50 = vsub.f32 %v1223_v43, %v1307_v49 }
 0x677   :  { %v1313_v51 = vmul.f32 1.442695, %v1311_v50 }
 0x678   :  { %v1310_v52 = vpop.xlane.xlu1 %1309 }
 0x679   :  { %2303 = vpow2.f32 %v1313_v51  ;;  %v1312_v53 = vsub.f32 %v1301_v25, %v1310_v52 }
 0x67b   :  { %v1315_v54 = vmul.f32 1.442695, %v1312_v53 }
 0x67d   :  { %2305 = vpow2.f32 %v1315_v54 }
 0x683   :  { %v2304_v55 = vpop.eup %2303 }
 0x684   :  { %v1317_v58 = vsel %vm479_vm3, %v2304_v55, 0.0 }
 0x685   :  { %1318 = vadd.xlane.f32.xlu1 %v1317_v58 }
 0x687   :  { %v2306_v59 = vpop.eup %2305 }
 0x688   :  { %v1320_v60 = vsel %vm479_vm3, %v2306_v59, 0.0 }
 0x689   :  { %1321 = vadd.xlane.f32.xlu1 %v1320_v60 }
 0x69a   :  { %1327 = vrot.lane.b32.xlu1 %v2518_v57, %s2346_s14 }
 0x69e   :  { %1643 = vrot.lane.b32.xlu1 %v2475_v28, %s2347_s8 }
 0x6b4   :  { %v899_v61 = vpop.f32.mrb[6].mxu0 }
 0x6b5   :  { %v2183_v62 = vpop.f32.mrb[7].mxu0  ;;  %2191 = vmatprep.mubr.msk.f32.mxu0 %vm326_vm2, %v899_v61 }
 0x6b6   :  { %2192 = vmatmul.mubr.msk.f32.vlgmr.msra.gmra.mrb[8].mxu0 %vm326_vm2, %v976_v42 }
 0x6b7   :  { %2196 = vmatprep.mubr.msk.f32.mxu0 %vm326_vm2, %v2546_v4  ;;  %2195 = vmatpush3.msk.msra.mxu0 %vm988_vm4, %v324_v47 }
 0x6b8   :  { %2209 = vmatprep.subr.mxu0 %v2343_v16 }
 0x6be   :  { %2197 = vmatmul.mubr.msk.f32.vlgmr.msra.gmra.mrb[8].mxu0 %vm326_vm2, %v2548_v7 }
 0x6bf   :  { %2211 = vmatprep.mubr.msk.f32.mxu0 %vm2344_vm1, %v2343_v16 }
 0x712   :  { %v1319_v28 = vpop.xlane.xlu1 %1318 }
 0x713   :  { %2307 = vrcp.f32 %v1319_v28 }
 0x716   :  { %v1322_v63 = vpop.xlane.xlu1 %1321 }
 0x717   :  { %2309 = vrcp.f32 %v1322_v63 }
 0x71a   :  { %v1328_v1 = vpop.permute.xlu1 %1327 }
 0x71b   :  { %2210 = vmatpush3.msra.mxu0 %v1328_v1 }
 0x71c   :  { %2219 = vmatprep.subr.msk.mxu0 %vm988_vm4, %v2615_v0 }
 0x71d   :  { %v2308_v3 = vpop.eup %2307 }
 0x71e   :  { %v1325_v4 = vmul.f32 %v2308_v3, %v2304_v55  ;;  %v1644_v13 = vpop.permute.xlu1 %1643 }
 0x720   :  { %2212 = vmatmul.mubr.msk.f32.vlgmr.msra.gmra.mrb[10].mxu0 %vm479_vm3, %v1325_v4 }
 0x721   :  { %v2310_v5 = vpop.eup %2309  ;;  %2220 = vmatpush3.msk.msra.mxu0 %vm988_vm4, %v2615_v0 }
 0x722   :  { %v1326_v7 = vmul.f32 %v2310_v5, %v2306_v59  ;;  %2229 = vmatprep.subr.mxu0 %v2343_v16 }
 0x724   :  { %2217 = vmatmul.mubr.msk.f32.vlgmr.msra.gmra.mrb[18].mxu1 %vm479_vm3, %v1326_v7 }
 0x725   :  { %2225 = vmatpush3.xpose.msk.msra.mxu1 %vm326_vm2, %v1568_v2  ;;  %2226 = vmatprep.mubr.msk.f32.mxu1 %vm2344_vm1, %v2343_v16 }
 0x726   :  { %2234 = vmatprep.subr.mxu1 %v2343_v16 }
 0x728   :  { %2227 = vmatmul.mubr.msk.f32.vlgmr.msra.gmra.mrb[20].mxu1 %vm326_vm2, %v1566_v8 }
 0x729   :  { %2236 = vmatprep.mubr.msk.f32.mxu1 %vm2344_vm1, %v2343_v16 }
 0x7f3   :  { %v1399_v9 = vpop.f32.mrb[10].mxu0 }
 0x7f4   :  { %v2213_v10 = vpop.f32.mrb[11].mxu0  ;;  %2221 = vmatprep.mubr.msk.f32.mxu0 %vm326_vm2, %v1399_v9 }
 0x7f7   :  { %v1475_v11 = vpop.f32.mrb[18].mxu1 }
 0x7f8   :  { %v2218_v12 = vpop.f32.mrb[19].mxu1  ;;  %2222 = vmatmul.mubr.msk.f32.vlgmr.msra.gmra.mrb[8].mxu0 %vm326_vm2, %v1475_v11 }
 0x7f9   :  { %2230 = vmatpush3.xpose.msk.msra.mxu0 %vm326_vm2, %v1646_v6  ;;  %2231 = vmatprep.mubr.msk.f32.mxu0 %vm2344_vm1, %v2343_v16 }
 0x7fa   :  { %2239 = vmatprep.subr.mxu0 %v2343_v16 }
 0x7fb   :  { %v1639_v14 = vpop.f32.mrb[20].mxu1 }
 0x7fc   :  { %v2228_v15 = vpop.f32.mrb[21].mxu1  ;;  %2232 = vmatmul.mubr.msk.f32.vlgmr.msra.gmra.mrb[12].mxu0 %vm326_vm2, %v1644_v13  ;;  %v1721_v17 = vsel %vm479_vm3, %v1639_v14, -inf }
 0x7fd   :  { %1722 = vmax.xlane.f32.xlu0 %v1721_v17  ;;  %2241 = vmatprep.mubr.msk.f32.mxu0 %vm2344_vm1, %v2343_v16  ;;  %v1895_v16 = vrot.slane %v2615_v0, 4 }
 0x88a   :  { %v1723_v18 = vpop.xlane.xlu0 %1722 }
 0x88b   :  { %v1727_v19 = vsub.f32 %v1639_v14, %v1723_v18 }
 0x88d   :  { %v1729_v20 = vmul.f32 1.442695, %v1727_v19 }
 0x88f   :  { %2311 = vpow2.f32 %v1729_v20 }
 0x899   :  { %v2312_v21 = vpop.eup %2311 }
 0x89a   :  { %v1733_v22 = vsel %vm479_vm3, %v2312_v21, 0.0 }
 0x89b   :  { %1734 = vadd.xlane.f32.xlu0 %v1733_v22 }
 0x8cf   :  { %v1717_v23 = vpop.f32.mrb[12].mxu0 }
 0x8d0   :  { %v2233_v26 = vpop.f32.mrb[13].mxu0  ;;  %v1724_v29 = vsel %vm479_vm3, %v1717_v23, -inf }
 0x8d1   :  { %1725 = vmax.xlane.f32.xlu1 %v1724_v29 }
 0x8e2   :  { %1819 = vrot.lane.b32.xlu1 %v2516_v56, %s2347_s8 }
 0x928   :  { %v1735_v36 = vpop.xlane.xlu0 %1734 }
 0x95e   :  { %v1726_v30 = vpop.xlane.xlu1 %1725 }
 0x95f   :  { %v1728_v31 = vsub.f32 %v1717_v23, %v1726_v30 }
 0x961   :  { %v1731_v32 = vmul.f32 1.442695, %v1728_v31 }
 0x962   :  { %v1820_v33 = vpop.permute.xlu1 %1819 }
 0x963   :  { %2313 = vpow2.f32 %v1731_v32  ;;  %2240 = vmatpush3.msra.mxu0 %v1820_v33 }
 0x964   :  { %2244 = vmatprep.subr.msk.mxu0 %vm988_vm4, %v1895_v16  ;;  %2315 = vrcp.f32 %v1735_v36 }
 0x96d   :  { %v2314_v34 = vpop.eup %2313 }
 0x96e   :  { %v1736_v35 = vsel %vm479_vm3, %v2314_v34, 0.0  ;;  %v2316_v37 = vpop.eup %2315 }
 0x96f   :  { %1737 = vadd.xlane.f32.xlu0 %v1736_v35  ;;  %v1741_v38 = vmul.f32 %v2316_v37, %v2312_v21 }
 0x985   :  { %1743 = vrot.lane.b32.xlu0 %v2518_v57, %s2347_s8 }
 0x9fc   :  { %v1738_v56 = vpop.xlane.xlu0 %1737 }
 0x9fd   :  { %2317 = vrcp.f32 %v1738_v56 }
 0xa00   :  { %v1744_v39 = vpop.permute.xlu0 %1743 }
 0xa01   :  { %2235 = vmatpush3.msra.mxu1 %v1744_v39 }
 0xa02   :  { %2237 = vmatmul.mubr.msk.f32.vlgmr.msra.gmra.mrb[22].mxu1 %vm479_vm3, %v1741_v38 }
 0xa07   :  { %v2318_v40 = vpop.eup %2317 }
 0xa08   :  { %v1742_v41 = vmul.f32 %v2318_v40, %v2314_v34 }
 0xa0a   :  { %2242 = vmatmul.mubr.msk.f32.vlgmr.msra.gmra.mrb[14].mxu0 %vm479_vm3, %v1742_v41 }
 0xa0b   :  { %2245 = vmatpush3.msk.msra.mxu0 %vm988_vm4, %v1895_v16 }
 0xad5   :  { %v1815_v42 = vpop.f32.mrb[22].mxu1 }
 0xad6   :  { %v2238_v24 = vpop.f32.mrb[23].mxu1  ;;  %2246 = vmatprep.mubr.msk.f32.mxu0 %vm326_vm2, %v1815_v42 }
 0xadd   :  { %v1891_v57 = vpop.f32.mrb[14].mxu0 }
 0xade   :  { %v2243_v43 = vpop.f32.mrb[15].mxu0  ;;  %2247 = vmatmul.mubr.msk.f32.vlgmr.msra.gmra.mrb[8].mxu0 %vm326_vm2, %v1891_v57 }
 0xbb1   :  { %v2248_v27 = vpop.f32.mrb[8].mxu0 }
 0xbb2   :  { %v1989_v25 = vadd.f32 %v2248_v27, %v2053_v44  ;;  %v1970_v45 = vpop.f32.mrb[9].mxu0 }
 0xbb3   :  { %v1988_v46 = vadd.f32 %v2053_v44, %v1970_v45 }
 0xbb4   :  { %1991 = vst.msk [vmem:[#allocation2 + $0x8] sm:$0xff] %vm52_vm0, %v1989_v25 }
 0xbb5   :  { %1990 = vst.msk [vmem:[#allocation2] sm:$0xff] %vm52_vm0, %v1988_v46 }
 0xbb6   :  { %2330 = shalt.err (!%p2327_p4)
}
 0xbb7   :  { %s2331_s0 = scalar_lea.hbm %s2683_s11, 256 }
 0xbb8   :  { %p2332_p5 = scmp.ne.s32.totalorder %s2683_s11, %s2331_s0  ;;  %p2335_p6 = scmp.lt.u32.totalorder %s2331_s0, %s2683_s11 }
 0xbba   :  { %p2337_p7 = pnand %p2335_p6, %p2332_p5 }
 0xbbc   :  { %2340 = shalt.err (!%p2337_p7)
}
 0xbbd   :  { %s2349_s23 = smov 128   ;;  %s2350_s24 = smov 8  }
 0xbbe   :  { %2003 = dma.vmem_to_hbm [thread:$0]  %s1998_s19, 256, %s2683_s11, [#allocation3], %s2349_s23, %s2349_s23, %s2350_s24  }
 0xbbf   :  { %2341 = dma.done.wait [#allocation3], 256  }
 0xbc0   :  { %2342 = vsyncadd [#allocation3], 4294967040 }
 0xbc1   :  { %2007 = vsyncpa [#allocation3], 1 }

</bundles_post_ra>
